<compile_context>
chip_gen: v7x
topology: tpu7x:2x2x1
jax: 0.10.0
libtpu: 0.0.40
codegen_flags: <defaults>
</compile_context>

<pallas_src>
import jax
import jax.numpy as jnp
from jax.experimental import pallas as pl
from jax.experimental.pallas import tpu as pltpu

_EPS = 1e-5


def _linproj_kernel(x_ref, wt_ref, gamma_ref, beta_ref, o_ref):
    b = x_ref.shape[0]
    inv_b = jnp.float32(1.0 / b)

    # bf16 operands for the MXU; f32 accumulation.
    x = x_ref[...].astype(jnp.bfloat16)      # (B, n_in)
    wt = wt_ref[...]                          # (n_in, TN), bf16, pre-transposed in prep

    # Linear (bias omitted: exactly cancelled by the BN mean subtraction below).
    y = jnp.dot(x, wt, preferred_element_type=jnp.float32)   # (B, TN) f32

    # BatchNorm1d, training mode: one-pass per-feature sum / sum-of-squares.
    s1 = jnp.sum(y, axis=0, keepdims=True)                    # (1, TN)
    s2 = jnp.sum(y * y, axis=0, keepdims=True)                # (1, TN)
    mean = s1 * inv_b
    var = jnp.maximum(s2 * inv_b - mean * mean, 0.0)          # clamp cancellation negatives
    scale = gamma_ref[...] * jax.lax.rsqrt(var + _EPS)        # folded per-feature scale

    o_ref[...] = ((y - mean) * scale + beta_ref[...]).astype(o_ref.dtype)


def _pick_tile_n(n_out):
    """Output-feature (lane) tile: 256 fills the 256-wide MXU on v6e/v7x,
    128 on v4/v5 (128x128 MXUs). Never adds padding beyond the 128-pad."""
    try:
        kind = jax.devices()[0].device_kind.lower()
    except Exception:
        kind = ""
    pref = 128 if ("v4" in kind or "v5" in kind) else 256
    n128 = pl.cdiv(n_out, 128) * 128
    if pref == 256 and n128 % 256 == 0:
        return 256
    return 128


def prepare_params(weight, gamma, beta, tn):
    """One-time parameter prep (hoisted out of the per-call hot path):
    lane-pad n_out to a multiple of tn, transpose weight to (n_in, n_pad), cast to bf16."""
    n_out = weight.shape[0]
    n_pad = pl.cdiv(n_out, tn) * tn
    if n_pad != n_out:
        weight = jnp.pad(weight, ((0, n_pad - n_out), (0, 0)))
        gamma = jnp.pad(gamma, (0, n_pad - n_out))
        beta = jnp.pad(beta, (0, n_pad - n_out))
    wt = jnp.asarray(weight.T, dtype=jnp.bfloat16)              # (n_in, n_pad)
    g2 = gamma.reshape(1, n_pad).astype(jnp.float32)
    b2 = beta.reshape(1, n_pad).astype(jnp.float32)
    return wt, g2, b2


def linear_projection_prepared(x, wt, gamma2, beta2, n_out, tn):
    """Hot path: x (B, n_in) f32; wt (n_in, n_pad) bf16; gamma2/beta2 (1, n_pad) f32."""
    B, n_in = x.shape
    n_pad = wt.shape[1]
    grid = (n_pad // tn,)

    # VMEM budget: double-buffered x (f32), weight tiles (bf16), output tiles (f32).
    est = 2 * B * n_in * 4 + 2 * n_in * tn * 2 + 2 * B * tn * 4 + 4 * tn * 4
    vmem_limit = int(min(max(2 * est, 16 << 20), 48 << 20))

    out = pl.pallas_call(
        _linproj_kernel,
        out_shape=jax.ShapeDtypeStruct((B, n_pad), jnp.float32),
        grid_spec=pltpu.PrefetchScalarGridSpec(
            num_scalar_prefetch=0,
            grid=grid,
            in_specs=[
                pl.BlockSpec((B, n_in), lambda j: (0, 0)),    # x: resident across tiles
                pl.BlockSpec((n_in, tn), lambda j: (0, j)),   # pre-transposed bf16 weight tile
                pl.BlockSpec((1, tn), lambda j: (0, j)),      # gamma
                pl.BlockSpec((1, tn), lambda j: (0, j)),      # beta
            ],
            out_specs=pl.BlockSpec((B, tn), lambda j: (0, j)),
        ),
        compiler_params=pltpu.CompilerParams(
            dimension_semantics=("parallel",),  # per-feature BN -> n_out tiles independent
            vmem_limit_bytes=vmem_limit,
        ),
    )(x, wt, gamma2, beta2)

    return out[:, :n_out]


def linear_projection(x, weight, bias, gamma, beta):
    """x: (B, n_in) f32; weight: (n_out, n_in) as in nn.Linear; returns (B, n_out) f32.

    `bias` is accepted for parity with the PyTorch module but unused: with
    training-mode BatchNorm right after the Linear, (xW + b) - mean(xW + b) == xW - mean(xW).
    In production, call prepare_params() once and reuse its outputs across calls.
    """
    del bias
    n_out = weight.shape[0]
    tn = _pick_tile_n(n_out)
    wt, g2, b2 = prepare_params(weight, gamma, beta, tn)
    return linear_projection_prepared(x, wt, g2, b2, n_out, tn)


def _reference(x, weight, bias, gamma, beta):
    y = x @ weight.T + bias
    mean = jnp.mean(y, axis=0, keepdims=True)
    var = jnp.mean((y - mean) ** 2, axis=0, keepdims=True)
    return (y - mean) / jnp.sqrt(var + _EPS) * gamma + beta


if __name__ == "__main__":
    key = jax.random.PRNGKey(0)
    B, n_in, n_out = 8, 32, 64

    k_x, k_w = jax.random.split(key)
    x = jax.random.normal(k_x, (B, n_in), dtype=jnp.float32)

    # Deterministic parameter init mirroring _init_params():
    #   xavier_normal_ on fc weight, zeros bias, BN gamma=1 beta=0.
    xavier_std = (2.0 / (n_in + n_out)) ** 0.5
    weight = xavier_std * jax.random.normal(k_w, (n_out, n_in), dtype=jnp.float32)
    bias = jnp.zeros((n_out,), dtype=jnp.float32)
    gamma = jnp.ones((n_out,), dtype=jnp.float32)
    beta = jnp.zeros((n_out,), dtype=jnp.float32)

    out = linear_projection(x, weight, bias, gamma, beta)
    out = jax.block_until_ready(out)

    ref = _reference(x, weight, bias, gamma, beta)
    assert out.shape == (B, n_out)
    # Tolerance relaxed vs the pure-f32 path: the matmul operands are bf16 on the MXU
    # (accumulation and BN statistics remain f32).
    assert jnp.allclose(out, ref, atol=3e-2, rtol=3e-2), "mismatch vs reference"
    print("KERNEL_OK")
</pallas_src>

<mosaic_0001>
module attributes {stable_mosaic.version = 11 : i64} {
  func.func @_linproj_kernel(%arg0: i32, %arg1: memref<8x32xf32, #tpu.memory_space<vmem>>, %arg2: memref<32x128xbf16, #tpu.memory_space<vmem>>, %arg3: memref<1x128xf32, #tpu.memory_space<vmem>>, %arg4: memref<1x128xf32, #tpu.memory_space<vmem>>, %arg5: memref<8x128xf32, #tpu.memory_space<vmem>>) attributes {dimension_semantics = [#tpu.dimension_semantics<parallel>], iteration_bounds = array<i64: 1>, scalar_prefetch = 0 : i64, scratch_operands = 0 : i64, tpu.core_type = #tpu.core_type<tc>, window_params = [{pipeline_mode = #tpu.pipeline_mode<synchronous>, transform_indices = @transform_0, window_bounds = array<i64: 8, 32>}, {transform_indices = @transform_1, window_bounds = array<i64: 32, 128>}, {transform_indices = @transform_2, window_bounds = array<i64: 1, 128>}, {transform_indices = @transform_3, window_bounds = array<i64: 1, 128>}, {transform_indices = @transform_4, window_bounds = array<i64: 8, 128>}]} {
    %c0 = arith.constant 0 : index
    %c0_0 = arith.constant 0 : index
    %0 = vector.load %arg1[%c0, %c0_0] : memref<8x32xf32, #tpu.memory_space<vmem>>, vector<8x32xf32>
    %1 = arith.truncf %0 : vector<8x32xf32> to vector<8x32xbf16>
    %c0_1 = arith.constant 0 : index
    %c0_2 = arith.constant 0 : index
    %2 = vector.load %arg2[%c0_1, %c0_2] : memref<32x128xbf16, #tpu.memory_space<vmem>>, vector<32x128xbf16>
    %cst = arith.constant dense<0.000000e+00> : vector<8x128xf32>
    %3 = tpu.matmul %1, %2, %cst {dimension_numbers = #tpu.dot_dimension_numbers<[1], [0], [0], [1], [0, 0, 1, 1], [], []>} : vector<8x32xbf16>, vector<32x128xbf16>, vector<8x128xf32> -> vector<8x128xf32>
    %cst_3 = arith.constant dense<0.000000e+00> : vector<128xf32>
    %4 = vector.multi_reduction <add>, %3, %cst_3 [0] : vector<8x128xf32> to vector<128xf32>
    %5 = vector.shape_cast %4 : vector<128xf32> to vector<1x128xf32>
    %6 = arith.mulf %3, %3 : vector<8x128xf32>
    %cst_4 = arith.constant dense<0.000000e+00> : vector<128xf32>
    %7 = vector.multi_reduction <add>, %6, %cst_4 [0] : vector<8x128xf32> to vector<128xf32>
    %8 = vector.shape_cast %7 : vector<128xf32> to vector<1x128xf32>
    %cst_5 = arith.constant 1.250000e-01 : f32
    %9 = vector.broadcast %cst_5 : f32 to vector<1x128xf32>
    %10 = arith.mulf %5, %9 : vector<1x128xf32>
    %cst_6 = arith.constant 1.250000e-01 : f32
    %11 = vector.broadcast %cst_6 : f32 to vector<1x128xf32>
    %12 = arith.mulf %8, %11 : vector<1x128xf32>
    %13 = arith.mulf %10, %10 : vector<1x128xf32>
    %14 = arith.subf %12, %13 : vector<1x128xf32>
    %cst_7 = arith.constant 0.000000e+00 : f32
    %15 = vector.broadcast %cst_7 : f32 to vector<1x128xf32>
    %16 = arith.maximumf %14, %15 : vector<1x128xf32>
    %c0_8 = arith.constant 0 : index
    %c0_9 = arith.constant 0 : index
    %17 = vector.load %arg3[%c0_8, %c0_9] : memref<1x128xf32, #tpu.memory_space<vmem>>, vector<1x128xf32>
    %cst_10 = arith.constant 9.99999974E-6 : f32
    %18 = vector.broadcast %cst_10 : f32 to vector<1x128xf32>
    %19 = arith.addf %16, %18 : vector<1x128xf32>
    %20 = math.rsqrt %19 : vector<1x128xf32>
    %21 = arith.mulf %17, %20 : vector<1x128xf32>
    %22 = vector.broadcast %10 : vector<1x128xf32> to vector<8x128xf32>
    %23 = arith.subf %3, %22 : vector<8x128xf32>
    %24 = vector.broadcast %21 : vector<1x128xf32> to vector<8x128xf32>
    %25 = arith.mulf %23, %24 : vector<8x128xf32>
    %c0_11 = arith.constant 0 : index
    %c0_12 = arith.constant 0 : index
    %26 = vector.load %arg4[%c0_11, %c0_12] : memref<1x128xf32, #tpu.memory_space<vmem>>, vector<1x128xf32>
    %27 = vector.broadcast %26 : vector<1x128xf32> to vector<8x128xf32>
    %28 = arith.addf %25, %27 : vector<8x128xf32>
    %c0_13 = arith.constant 0 : index
    %c0_14 = arith.constant 0 : index
    %29 = vector.load %arg5[%c0_13, %c0_14] : memref<8x128xf32, #tpu.memory_space<vmem>>, vector<8x128xf32>
    tpu.vector_store %arg5[%c0_13, %c0_14], %28 {strides = array<i32>} : memref<8x128xf32, #tpu.memory_space<vmem>>, vector<8x128xf32>,
    return
  }
  func.func @transform_0(%arg0: i32) -> (i32, i32) {
    %c0_i32 = arith.constant 0 : i32
    %c0_i32_0 = arith.constant 0 : i32
    %c0_i32_1 = arith.constant 0 : i32
    return %c0_i32, %c0_i32_0 : i32, i32
  }
  func.func @transform_1(%arg0: i32) -> (i32, i32) {
    %c0_i32 = arith.constant 0 : i32
    %c0_i32_0 = arith.constant 0 : i32
    return %c0_i32, %arg0 : i32, i32
  }
  func.func @transform_2(%arg0: i32) -> (i32, i32) {
    %c0_i32 = arith.constant 0 : i32
    %c0_i32_0 = arith.constant 0 : i32
    return %c0_i32, %arg0 : i32, i32
  }
  func.func @transform_3(%arg0: i32) -> (i32, i32) {
    %c0_i32 = arith.constant 0 : i32
    %c0_i32_0 = arith.constant 0 : i32
    return %c0_i32, %arg0 : i32, i32
  }
  func.func @transform_4(%arg0: i32) -> (i32, i32) {
    %c0_i32 = arith.constant 0 : i32
    %c0_i32_0 = arith.constant 0 : i32
    return %c0_i32, %arg0 : i32, i32
  }
}

</mosaic_0001>

<bundles_post_ra>
// kernel: tpu_custom_call.1
= control target key start
LH: loop header
LB: loop body
LE: loop exit
PB: predicated region body
PF: predicated region fallthrough
CT: control target
= control target key end

     0   :  { %9 = vsyncpa [#allocation3], 0  ;;  %s341_s0 = inlined_call_operand.hbm [shape: f32[8,32], index: 0, kind: input, shape index: {}]   ;;  %s342_s1 = inlined_call_operand.hbm [shape: bf16[32,128], index: 1, kind: input, shape index: {}]   ;;  %s343_s2 = inlined_call_operand.vmem [shape: f32[1,128], index: 2, kind: input, shape index: {}]   ;;  %s344_s3 = inlined_call_operand.vmem [shape: f32[1,128], index: 3, kind: input, shape index: {}]   ;;  %s345_s4 = inlined_call_operand.hbm [shape: f32[8,128], index: 4, kind: output, shape index: {}]  }
   0x1   :  { %10 = vsyncpa [#allocation6], 0 }
   0x2   :  { %11 = vsyncpa [#allocation4], 0  ;;  %s260_s15 = smov [#allocation2]   ;;  %s261_s17 = smov [#allocation5]  }
   0x3   :  { %s18_s16 = sshll.u32 %s260_s15, 4  ;;  %s27_s18 = sshll.u32 %s261_s17, 4  ;;  %s19_s16 = int_to_ptr.vmem [resolvable:$true] %s18_s16  ;;  %s292_s18 = int_to_ptr.vmem [resolvable:$true] %s27_s18 }
   0x4   :  { %s188_s21 = scalar_lea.hbm %s341_s0, 128 }
   0x5   :  { %p189_p0 = scmp.ne.s32.totalorder %s341_s0, %s188_s21  ;;  %p192_p1 = scmp.lt.u32.totalorder %s188_s21, %s341_s0 }
   0x7   :  { %p194_p2 = pnand %p192_p1, %p189_p0 }
   0x9   :  { %197 = shalt.err (!%p194_p2)
}
   0xa   :  { %s198_s26 = scalar_lea.vmem %s19_s16, 128  ;;  %p203_p4 = scmp.lt.s32.totalorder %s19_s16, %s19_s16 }
   0xb   :  { %p199_p3 = scmp.ne.s32.totalorder %s19_s16, %s198_s26  ;;  %p204_p5 = scmp.lt.s32.totalorder %s198_s26, %s198_s26 }
   0xd   :  { %p205_p6 = por %p204_p5, %p203_p4 }
   0xf   :  { %p206_p7 = pnand %p205_p6, %p199_p3 }
  0x11   :  { %209 = shalt.err (!%p206_p7)
}
  0x12   :  { %21 = dma.hbm_to_vmem [thread:$0]  %s341_s0, 128, %s19_s16, [#allocation3]  }
  0x13   :  { %s210_s5 = scalar_lea.hbm %s342_s1, 256 }
  0x14   :  { %p211_p8 = scmp.ne.s32.totalorder %s342_s1, %s210_s5  ;;  %p214_p9 = scmp.lt.u32.totalorder %s210_s5, %s342_s1 }
  0x16   :  { %p216_p10 = pnand %p214_p9, %p211_p8 }
  0x18   :  { %219 = shalt.err (!%p216_p10)
}
  0x19   :  { %s220_s10 = scalar_lea.vmem %s292_s18, 256  ;;  %p225_p12 = scmp.lt.s32.totalorder %s292_s18, %s292_s18 }
  0x1a   :  { %p221_p11 = scmp.ne.s32.totalorder %s292_s18, %s220_s10  ;;  %p226_p13 = scmp.lt.s32.totalorder %s220_s10, %s220_s10 }
  0x1c   :  { %p227_p0 = por %p226_p13, %p225_p12 }
  0x1e   :  { %p228_p1 = pnand %p227_p0, %p221_p11 }
  0x20   :  { %231 = shalt.err (!%p228_p1)
}
  0x21   :  { %s262_s0 = smov 64   ;;  %s263_s11 = smov 4  }
  0x22   :  { %33 = dma.hbm_to_vmem [thread:$0]  %s342_s1, 256, %s292_s18, [#allocation6], %s262_s0, %s262_s0, %s263_s11  }
  0x23   :  { %254 = dma.done.wait [#allocation3], 128  }
  0x24   :  { %255 = vsyncadd [#allocation3], 4294967168 }
  0x25   :  { %256 = dma.done.wait [#allocation6], 256  }
  0x26   :  { %257 = vsyncadd [#allocation6], 4294967040  ;;  %v264_v0 = vmov 0.0   ;;  %vm265_vm0 = vmmov 0   ;;  %v184_v1 = vld [vmem:[#allocation5] sm:$0xff]   ;;  %v185_v2 = vld [vmem:[#allocation5 + $0x8] sm:$0xff]   ;;  %v131_v28 = vlaneseq }
  0x27   :  { %169 = vmatprep.subr.bf16.mxu0 %v264_v0  ;;  %173 = vmatprep.mubr.msk.bf16.mxu0 %vm265_vm0, %v264_v0  ;;  %v45_v3 = vld [vmem:[#allocation2] sm:$0xff]  ;;  %vm63_vm1 = vcmask 261120   ;;  %s266_s17 = smov [#allocation7]  }
  0x28   :  { %170 = vmatpush3.bf16.msra.mxu0 %v184_v1  ;;  %v46_v4 = vpack.c.bf16 %v45_v3, %v45_v3  ;;  %v132_v29 = vshrl.u32 %v131_v28, 7  ;;  %v125_v30 = vld [vmem:[%s343_s2] sm:$0x1]  ;;  %s152_s18 = sshll.u32 %s266_s17, 4  ;;  %s153_s18 = int_to_ptr.vmem [resolvable:$true] %s152_s18 }
  0x29   :  { %171 = vmatprep.subr.bf16.mxu0 %v264_v0  ;;  %v165_v36 = vld [vmem:[%s344_s3] ss:$0 sm:$0xff]  ;;  %s232_s19 = scalar_lea.vmem %s153_s18, 128  ;;  %p237_p3 = scmp.lt.s32.totalorder %s153_s18, %s153_s18 }
  0x2a   :  { %v133_v31 = vsub.s32 0, %v132_v29  ;;  %p233_p2 = scmp.ne.s32.totalorder %s153_s18, %s232_s19  ;;  %p238_p4 = scmp.lt.s32.totalorder %s232_s19, %s232_s19 }
  0x2c   :  { %172 = vmatpush3.bf16.msra.mxu0 %v185_v2  ;;  %p239_p5 = por %p238_p4, %p237_p3 }
  0x2e   :  { %p240_p6 = pnand %p239_p5, %p233_p2 }
  0x2f   :  { %174 = vmatmul.mubr.msk.bf16.vlgmr.msra.gmra.mrb[0].mxu0 %vm63_vm1, %v46_v4 }
 0x102   :  { %v101_v5 = vpop.f32.mrb[0].mxu0 }
 0x103   :  { %v107_v6 = vrot.slane %v101_v5, 4  ;;  %v113_v7 = vmul.f32 %v101_v5, %v101_v5  ;;  %v175_v8 = vpop.f32.mrb[1].mxu0 }
 0x104   :  { %v104_v9 = vpop.f32.mrb[2].mxu0 }
 0x105   :  { %v108_v10 = vadd.f32 %v107_v6, %v101_v5  ;;  %v114_v11 = vrot.slane %v113_v7, 4  ;;  %v176_v12 = vpop.f32.mrb[3].mxu0 }
 0x107   :  { %v109_v13 = vrot.slane %v108_v10, 2  ;;  %v115_v14 = vadd.f32 %v114_v11, %v113_v7 }
 0x109   :  { %v110_v15 = vadd.f32 %v109_v13, %v108_v10  ;;  %v116_v16 = vrot.slane %v115_v14, 2 }
 0x10b   :  { %v111_v17 = vrot.slane %v110_v15, 1  ;;  %v117_v18 = vadd.f32 %v116_v16, %v115_v14 }
 0x10d   :  { %v112_v19 = vadd.f32 %v111_v17, %v110_v15  ;;  %v118_v20 = vrot.slane %v117_v18, 1 }
 0x10f   :  { %v119_v21 = vadd.f32 %v118_v20, %v117_v18  ;;  %v120_v22 = vmul.f32 0.125, %v112_v19 }
 0x111   :  { %v121_v23 = vmul.f32 0.125, %v119_v21  ;;  %v122_v24 = vmul.f32 %v120_v22, %v120_v22  ;;  %v129_v34 = vsub.f32 %v101_v5, %v120_v22 }
 0x113   :  { %v123_v25 = vsub.f32 %v121_v23, %v122_v24 }
 0x115   :  { %v124_v26 = vmax.f32 %v123_v25, 0.0 }
 0x117   :  { %v126_v27 = vadd.f32 1e-05, %v124_v26 }
 0x119   :  { %186 = vrsqrt.f32 %v126_v27 }
 0x123   :  { %v187_v32 = vpop.eup %186 }
 0x124   :  { %v128_v33 = vmul.f32 %v187_v32, %v125_v30 }
 0x126   :  { %v134_v35 = vrot.slane %v128_v33, %v133_v31 }
 0x128   :  { %v136_v37 = vmul.f32 %v134_v35, %v129_v34 }
 0x12a   :  { %v144_v38 = vadd.f32 %v165_v36, %v136_v37 }
 0x12c   :  { %145 = vst [vmem:[#allocation7] sm:$0xff] %v144_v38 }
 0x12d   :  { %243 = shalt.err (!%p240_p6)
}
 0x12e   :  { %s244_s21 = scalar_lea.hbm %s345_s4, 128 }
 0x12f   :  { %p245_p7 = scmp.ne.s32.totalorder %s345_s4, %s244_s21  ;;  %p248_p8 = scmp.lt.u32.totalorder %s244_s21, %s345_s4 }
 0x131   :  { %p250_p9 = pnand %p248_p8, %p245_p7 }
 0x133   :  { %253 = shalt.err (!%p250_p9)
}
 0x134   :  { %155 = dma.vmem_to_hbm [thread:$0]  %s153_s18, 128, %s345_s4, [#allocation4]  }
 0x135   :  { %258 = dma.done.wait [#allocation4], 128  }
 0x136   :  { %259 = vsyncadd [#allocation4], 4294967168 }
 0x137   :  { %159 = vsyncpa [#allocation3], 1 }
 0x138   :  { %160 = vsyncpa [#allocation6], 1 }
 0x139   :  { %161 = vsyncpa [#allocation4], 1 }

</bundles_post_ra>
